<compile_context>
chip_gen: v7x
topology: tpu7x:2x2x1
jax: 0.10.0
libtpu: 0.0.40
codegen_flags: <defaults>
</compile_context>

<pallas_src>
import functools

import jax
import jax.numpy as jnp
from jax.experimental import pallas as pl
from jax.experimental.pallas import tpu as pltpu


def _pad_to(n, m):
    return ((n + m - 1) // m) * m


# ----------------------------------------------------------------------------
# Tiled dense kernel:  o = act(x @ w + b)      (used for the backbone block)
# ----------------------------------------------------------------------------
def _dense_kernel(x_ref, w_ref, b_ref, o_ref, acc_ref, *, activation):
    k = pl.program_id(2)

    @pl.when(k == 0)
    def _():
        acc_ref[...] = jnp.zeros_like(acc_ref)

    acc_ref[...] += jnp.dot(x_ref[...], w_ref[...],
                            preferred_element_type=jnp.float32)

    @pl.when(k == pl.num_programs(2) - 1)
    def _():
        y = acc_ref[...] + b_ref[...]
        if activation == "gelu":
            # tanh-approx GELU in f32 (EUP tanh slot; no bf16 VPU needed -> v5e safe)
            y = 0.5 * y * (1.0 + jnp.tanh(
                0.7978845608028654 * (y + 0.044715 * y * y * y)))
        o_ref[...] = y.astype(o_ref.dtype)


def dense(x, w, b, activation=None, out_dtype=jnp.float32,
          tm=256, tn=256, tk=512):
    """x: (M, K), w: (K, N), b: (1, N) -> (M, N) in out_dtype."""
    M, K = x.shape
    K2, N = w.shape
    assert K2 == K

    # Shrink tiles for small problems; keep lane/sublane alignment.
    tm = min(tm, _pad_to(M, 16))     # 16-sublane aligned (bf16 inputs)
    tk = min(tk, _pad_to(K, 128))
    tn = min(tn, _pad_to(N, 128))
    M_pad, K_pad, N_pad = _pad_to(M, tm), _pad_to(K, tk), _pad_to(N, tn)

    x_p = jnp.pad(x.astype(jnp.bfloat16), ((0, M_pad - M), (0, K_pad - K)))
    w_p = jnp.pad(w.astype(jnp.bfloat16), ((0, K_pad - K), (0, N_pad - N)))
    b_p = jnp.pad(b.astype(jnp.float32), ((0, 0), (0, N_pad - N)))

    grid = (M_pad // tm, N_pad // tn, K_pad // tk)
    kernel = functools.partial(_dense_kernel, activation=activation)
    out_bytes = M_pad * N_pad * jnp.dtype(out_dtype).itemsize

    out = pl.pallas_call(
        kernel,
        out_shape=jax.ShapeDtypeStruct((M_pad, N_pad), out_dtype),
        grid=grid,
        in_specs=[
            pl.BlockSpec((tm, tk), lambda i, j, k: (i, k)),
            pl.BlockSpec((tk, tn), lambda i, j, k: (k, j)),
            pl.BlockSpec((1, tn), lambda i, j, k: (0, j)),
        ],
        out_specs=pl.BlockSpec((tm, tn), lambda i, j, k: (i, j)),
        scratch_shapes=[pltpu.VMEM((tm, tn), jnp.float32)],
        compiler_params=pltpu.CompilerParams(
            dimension_semantics=("parallel", "parallel", "arbitrary"),
            vmem_limit_bytes=32 * 1024 * 1024),
        cost_estimate=pl.CostEstimate(
            flops=2 * M_pad * K_pad * N_pad,
            transcendentals=M_pad * N_pad if activation == "gelu" else 0,
            bytes_accessed=2 * (M_pad * K_pad + K_pad * N_pad) + out_bytes),
    )(x_p, w_p, b_p)
    return out[:M, :N]


# ----------------------------------------------------------------------------
# Fused LM-head matmul + streaming cross entropy.
#   logits = x @ w + b                     (written out, (M, V) f32)
#   ce_row = logsumexp(logits_row) - logits_row[target]   (per-row, padded=0)
# Online logsumexp over vocab tiles -> logits slab is never re-read from HBM.
# ----------------------------------------------------------------------------
def _head_ce_kernel(x_ref, w_ref, b_ref, tgt_ref, o_ref, ce_ref,
                    acc_ref, m_ref, l_ref, t_ref, *,
                    num_valid, valid_cols, tm, tn):
    i = pl.program_id(0)
    j = pl.program_id(1)
    k = pl.program_id(2)
    nj = pl.num_programs(1)
    nk = pl.num_programs(2)

    @pl.when(jnp.logical_and(j == 0, k == 0))
    def _():
        m_ref[...] = jnp.full_like(m_ref, -1e30)
        l_ref[...] = jnp.zeros_like(l_ref)
        t_ref[...] = jnp.zeros_like(t_ref)

    @pl.when(k == 0)
    def _():
        acc_ref[...] = jnp.zeros_like(acc_ref)

    acc_ref[...] += jnp.dot(x_ref[...], w_ref[...],
                            preferred_element_type=jnp.float32)

    @pl.when(k == nk - 1)
    def _():
        y = acc_ref[...] + b_ref[...]                      # (tm, tn) f32 logits tile
        o_ref[...] = y.astype(o_ref.dtype)

        # online logsumexp + target pick (no one-hot materialized)
        col = jax.lax.broadcasted_iota(jnp.int32, (tm, tn), 1) + j * tn
        y_m = jnp.where(col < valid_cols, y, -1e30)        # mask padded vocab cols
        m_old = m_ref[...]
        m_new = jnp.maximum(m_old, jnp.max(y_m, axis=-1, keepdims=True))
        l_ref[...] = (l_ref[...] * jnp.exp(m_old - m_new)
                      + jnp.sum(jnp.exp(y_m - m_new), axis=-1, keepdims=True))
        t_ref[...] += jnp.sum(jnp.where(col == tgt_ref[...], y, 0.0),
                              axis=-1, keepdims=True)
        m_ref[...] = m_new

    @pl.when(jnp.logical_and(j == nj - 1, k == nk - 1))
    def _():
        row = jax.lax.broadcasted_iota(jnp.int32, (tm, 1), 0) + i * tm
        valid = (row < num_valid).astype(jnp.float32)      # zero out padded rows
        ce_ref[...] = (m_ref[...] + jnp.log(l_ref[...]) - t_ref[...]) * valid


def head_with_loss(x, w, b, targets, num_valid, out_dtype=jnp.float32,
                   tm=256, tn=256, tk=512):
    """x: (M, K), w: (K, V), b: (1, V), targets: (M,) int32.

    Returns (logits (M, V) f32, per-row CE (M_pad, 1) f32, padded rows = 0).
    """
    M, K = x.shape
    K2, V = w.shape
    assert K2 == K

    tm = min(tm, _pad_to(M, 16))
    tk = min(tk, _pad_to(K, 128))
    tn = min(tn, _pad_to(V, 128))
    M_pad, K_pad, V_pad = _pad_to(M, tm), _pad_to(K, tk), _pad_to(V, tn)

    x_p = jnp.pad(x.astype(jnp.bfloat16), ((0, M_pad - M), (0, K_pad - K)))
    w_p = jnp.pad(w.astype(jnp.bfloat16), ((0, K_pad - K), (0, V_pad - V)))
    b_p = jnp.pad(b.astype(jnp.float32), ((0, 0), (0, V_pad - V)))
    tgt_p = jnp.pad(targets.astype(jnp.int32), (0, M_pad - M)).reshape(M_pad, 1)

    grid = (M_pad // tm, V_pad // tn, K_pad // tk)
    kernel = functools.partial(_head_ce_kernel, num_valid=num_valid,
                               valid_cols=V, tm=tm, tn=tn)

    logits, ce_rows = pl.pallas_call(
        kernel,
        out_shape=(jax.ShapeDtypeStruct((M_pad, V_pad), out_dtype),
                   jax.ShapeDtypeStruct((M_pad, 1), jnp.float32)),
        grid=grid,
        in_specs=[
            pl.BlockSpec((tm, tk), lambda i, j, k: (i, k)),
            pl.BlockSpec((tk, tn), lambda i, j, k: (k, j)),
            pl.BlockSpec((1, tn), lambda i, j, k: (0, j)),
            pl.BlockSpec((tm, 1), lambda i, j, k: (i, 0)),
        ],
        out_specs=(pl.BlockSpec((tm, tn), lambda i, j, k: (i, j)),
                   pl.BlockSpec((tm, 1), lambda i, j, k: (i, 0))),
        scratch_shapes=[pltpu.VMEM((tm, tn), jnp.float32),   # matmul accumulator
                        pltpu.VMEM((tm, 1), jnp.float32),    # running row max
                        pltpu.VMEM((tm, 1), jnp.float32),    # running sum-exp
                        pltpu.VMEM((tm, 1), jnp.float32)],   # target logit
        compiler_params=pltpu.CompilerParams(
            dimension_semantics=("parallel", "arbitrary", "arbitrary"),
            vmem_limit_bytes=32 * 1024 * 1024),
        cost_estimate=pl.CostEstimate(
            flops=2 * M_pad * K_pad * V_pad,
            transcendentals=2 * M_pad * V_pad,
            bytes_accessed=2 * (M_pad * K_pad + K_pad * V_pad)
                           + 4 * M_pad * V_pad),
    )(x_p, w_p, b_p, tgt_p)
    return logits[:M, :V], ce_rows


# ----------------------------------------------------------------------------
# HugginFaceSeqTune forward
# ----------------------------------------------------------------------------
def init_params(key, vocab_size, hidden, context_size):
    k_emb, k_wb, k_wh = jax.random.split(key, 3)
    return {
        # synthetic frozen backbone: token embedding + dense+GELU block
        "embed": jax.random.normal(k_emb, (vocab_size, hidden), jnp.float32) * 0.02,
        "pos": jnp.linspace(-0.1, 0.1, context_size * hidden,
                            dtype=jnp.float32).reshape(context_size, hidden),
        "w_backbone": jax.random.normal(k_wb, (hidden, hidden), jnp.float32) * 0.02,
        "b_backbone": jnp.zeros((1, hidden), jnp.float32),
        # LM head (the `head` module: hidden -> vocab)
        "w_head": jax.random.normal(k_wh, (hidden, vocab_size), jnp.float32) * 0.02,
        "b_head": jnp.zeros((1, vocab_size), jnp.float32),
    }


def hugginface_seqtune_forward(params, x, targets=None):
    """x: (B, T) int32 token ids, targets: (B, T) int32 or None."""
    B, T = x.shape
    V, H = params["embed"].shape

    # --- backbone (stands in for HF model's last_hidden_state) ---
    emb = jnp.take(params["embed"], x.reshape(-1), axis=0)             # (B*T, H) gather (glue)
    emb = (emb.reshape(B, T, H) + params["pos"][:T][None]).reshape(B * T, H)
    hidden = dense(emb, params["w_backbone"], params["b_backbone"],    # Pallas matmul + GELU
                   activation="gelu", out_dtype=jnp.bfloat16)          # (B*T, H) bf16

    if targets is None:
        logits_flat = dense(hidden, params["w_head"], params["b_head"],
                            activation=None, out_dtype=jnp.float32)
        return logits_flat.reshape(B, T, V), None

    # --- head + SeqLoss (mean token CE), fused: logits slab read only once ---
    logits_flat, ce_rows = head_with_loss(
        hidden, params["w_head"], params["b_head"], targets.reshape(-1),
        num_valid=B * T)
    y = logits_flat.reshape(B, T, V)
    loss = jnp.sum(ce_rows) / (B * T)    # padded rows already zeroed in-kernel
    return y, loss


if __name__ == "__main__":
    B, T = 2, 8            # batch, context_size
    H, V = 32, 64          # hidden size, vocab size

    key = jax.random.PRNGKey(0)
    k_params, k_x, k_t = jax.random.split(key, 3)
    params = init_params(k_params, V, H, T)

    x = jax.random.randint(k_x, (B, T), 0, V, dtype=jnp.int32)
    targets = jax.random.randint(k_t, (B, T), 0, V, dtype=jnp.int32)

    fwd = jax.jit(hugginface_seqtune_forward)
    y, loss = fwd(params, x, targets)
    jax.block_until_ready((y, loss))

    assert y.shape == (B, T, V) and y.dtype == jnp.float32
    assert loss.shape == () and loss.dtype == jnp.float32
    assert bool(jnp.isfinite(loss))
    print("KERNEL_OK")
</pallas_src>

<mosaic_0001>
module attributes {stable_mosaic.version = 11 : i64} {
  func.func @_dense_kernel(%arg0: i32, %arg1: i32, %arg2: i32, %arg3: memref<16x128xbf16, #tpu.memory_space<vmem>>, %arg4: memref<128x128xbf16, #tpu.memory_space<vmem>>, %arg5: memref<1x128xf32, #tpu.memory_space<vmem>>, %arg6: memref<16x128xbf16, #tpu.memory_space<vmem>>, %arg7: memref<16x128xf32, #tpu.memory_space<vmem>>) attributes {dimension_semantics = [#tpu.dimension_semantics<parallel>, #tpu.dimension_semantics<parallel>, #tpu.dimension_semantics<arbitrary>], iteration_bounds = array<i64: 1, 1, 1>, scalar_prefetch = 0 : i64, scratch_operands = 1 : i64, tpu.core_type = #tpu.core_type<tc>, window_params = [{transform_indices = @transform_0, window_bounds = array<i64: 16, 128>}, {transform_indices = @transform_1, window_bounds = array<i64: 128, 128>}, {transform_indices = @transform_2, window_bounds = array<i64: 1, 128>}, {transform_indices = @transform_3, window_bounds = array<i64: 16, 128>}]} {
    %c0_i32 = arith.constant 0 : i32
    %0 = arith.cmpi eq, %arg2, %c0_i32 : i32
    %1 = arith.extui %0 : i1 to i32
    %c0_i32_0 = arith.constant 0 : i32
    %2 = arith.cmpi ne, %1, %c0_i32_0 : i32
    scf.if %2 {
      %cst_10 = arith.constant 0.000000e+00 : f32
      %12 = vector.broadcast %cst_10 : f32 to vector<16x128xf32>
      %c0_11 = arith.constant 0 : index
      %c0_12 = arith.constant 0 : index
      %13 = vector.load %arg7[%c0_11, %c0_12] : memref<16x128xf32, #tpu.memory_space<vmem>>, vector<16x128xf32>
      tpu.vector_store %arg7[%c0_11, %c0_12], %12 {strides = array<i32>} : memref<16x128xf32, #tpu.memory_space<vmem>>, vector<16x128xf32>,
    } else {
    }
    %c0 = arith.constant 0 : index
    %c0_1 = arith.constant 0 : index
    %3 = vector.load %arg7[%c0, %c0_1] : memref<16x128xf32, #tpu.memory_space<vmem>>, vector<16x128xf32>
    %c0_2 = arith.constant 0 : index
    %c0_3 = arith.constant 0 : index
    %4 = vector.load %arg3[%c0_2, %c0_3] : memref<16x128xbf16, #tpu.memory_space<vmem>>, vector<16x128xbf16>
    %c0_4 = arith.constant 0 : index
    %c0_5 = arith.constant 0 : index
    %5 = vector.load %arg4[%c0_4, %c0_5] : memref<128x128xbf16, #tpu.memory_space<vmem>>, vector<128x128xbf16>
    %cst = arith.constant dense<0.000000e+00> : vector<16x128xf32>
    %6 = tpu.matmul %4, %5, %cst {dimension_numbers = #tpu.dot_dimension_numbers<[1], [0], [0], [1], [0, 0, 1, 1], [], []>} : vector<16x128xbf16>, vector<128x128xbf16>, vector<16x128xf32> -> vector<16x128xf32>
    %7 = arith.addf %3, %6 : vector<16x128xf32>
    %c0_6 = arith.constant 0 : index
    %c0_7 = arith.constant 0 : index
    %8 = vector.load %arg7[%c0_6, %c0_7] : memref<16x128xf32, #tpu.memory_space<vmem>>, vector<16x128xf32>
    tpu.vector_store %arg7[%c0_6, %c0_7], %7 {strides = array<i32>} : memref<16x128xf32, #tpu.memory_space<vmem>>, vector<16x128xf32>,
    %c0_i32_8 = arith.constant 0 : i32
    %9 = arith.cmpi eq, %arg2, %c0_i32_8 : i32
    %10 = arith.extui %9 : i1 to i32
    %c0_i32_9 = arith.constant 0 : i32
    %11 = arith.cmpi ne, %10, %c0_i32_9 : i32
    scf.if %11 {
      %c0_10 = arith.constant 0 : index
      %c0_11 = arith.constant 0 : index
      %12 = vector.load %arg7[%c0_10, %c0_11] : memref<16x128xf32, #tpu.memory_space<vmem>>, vector<16x128xf32>
      %c0_12 = arith.constant 0 : index
      %c0_13 = arith.constant 0 : index
      %13 = vector.load %arg5[%c0_12, %c0_13] : memref<1x128xf32, #tpu.memory_space<vmem>>, vector<1x128xf32>
      %14 = vector.broadcast %13 : vector<1x128xf32> to vector<16x128xf32>
      %15 = arith.addf %12, %14 : vector<16x128xf32>
      %cst_14 = arith.constant 5.000000e-01 : f32
      %16 = vector.broadcast %cst_14 : f32 to vector<16x128xf32>
      %17 = arith.mulf %16, %15 : vector<16x128xf32>
      %cst_15 = arith.constant 4.471500e-02 : f32
      %18 = vector.broadcast %cst_15 : f32 to vector<16x128xf32>
      %19 = arith.mulf %18, %15 : vector<16x128xf32>
      %20 = arith.mulf %19, %15 : vector<16x128xf32>
      %21 = arith.mulf %20, %15 : vector<16x128xf32>
      %22 = arith.addf %15, %21 : vector<16x128xf32>
      %cst_16 = arith.constant 0.797884583 : f32
      %23 = vector.broadcast %cst_16 : f32 to vector<16x128xf32>
      %24 = arith.mulf %23, %22 : vector<16x128xf32>
      %25 = math.tanh %24 : vector<16x128xf32>
      %cst_17 = arith.constant 1.000000e+00 : f32
      %26 = vector.broadcast %cst_17 : f32 to vector<16x128xf32>
      %27 = arith.addf %26, %25 : vector<16x128xf32>
      %28 = arith.mulf %17, %27 : vector<16x128xf32>
      %29 = arith.truncf %28 : vector<16x128xf32> to vector<16x128xbf16>
      %c0_18 = arith.constant 0 : index
      %c0_19 = arith.constant 0 : index
      %30 = vector.load %arg6[%c0_18, %c0_19] : memref<16x128xbf16, #tpu.memory_space<vmem>>, vector<16x128xbf16>
      tpu.vector_store %arg6[%c0_18, %c0_19], %29 {strides = array<i32>} : memref<16x128xbf16, #tpu.memory_space<vmem>>, vector<16x128xbf16>,
    } else {
    }
    return
  }
  func.func @transform_0(%arg0: i32, %arg1: i32, %arg2: i32) -> (i32, i32) {
    %c0_i32 = arith.constant 0 : i32
    return %arg0, %arg2 : i32, i32
  }
  func.func @transform_1(%arg0: i32, %arg1: i32, %arg2: i32) -> (i32, i32) {
    %c0_i32 = arith.constant 0 : i32
    return %arg2, %arg1 : i32, i32
  }
  func.func @transform_2(%arg0: i32, %arg1: i32, %arg2: i32) -> (i32, i32) {
    %c0_i32 = arith.constant 0 : i32
    %c0_i32_0 = arith.constant 0 : i32
    return %c0_i32, %arg1 : i32, i32
  }
  func.func @transform_3(%arg0: i32, %arg1: i32, %arg2: i32) -> (i32, i32) {
    %c0_i32 = arith.constant 0 : i32
    return %arg0, %arg1 : i32, i32
  }
}

module attributes {stable_mosaic.version = 11 : i64} {
  func.func @_head_ce_kernel(%arg0: i32, %arg1: i32, %arg2: i32, %arg3: memref<16x128xbf16, #tpu.memory_space<vmem>>, %arg4: memref<128x128xbf16, #tpu.memory_space<vmem>>, %arg5: memref<1x128xf32, #tpu.memory_space<vmem>>, %arg6: memref<16x1xi32, #tpu.memory_space<vmem>>, %arg7: memref<16x128xf32, #tpu.memory_space<vmem>>, %arg8: memref<16x1xf32, #tpu.memory_space<vmem>>, %arg9: memref<16x128xf32, #tpu.memory_space<vmem>>, %arg10: memref<16x1xf32, #tpu.memory_space<vmem>>, %arg11: memref<16x1xf32, #tpu.memory_space<vmem>>, %arg12: memref<16x1xf32, #tpu.memory_space<vmem>>) attributes {dimension_semantics = [#tpu.dimension_semantics<parallel>, #tpu.dimension_semantics<arbitrary>, #tpu.dimension_semantics<arbitrary>], iteration_bounds = array<i64: 1, 1, 1>, scalar_prefetch = 0 : i64, scratch_operands = 4 : i64, tpu.core_type = #tpu.core_type<tc>, window_params = [{transform_indices = @transform_0, window_bounds = array<i64: 16, 128>}, {transform_indices = @transform_1, window_bounds = array<i64: 128, 128>}, {transform_indices = @transform_2, window_bounds = array<i64: 1, 128>}, {transform_indices = @transform_3, window_bounds = array<i64: 16, 1>}, {transform_indices = @transform_4, window_bounds = array<i64: 16, 128>}, {transform_indices = @transform_5, window_bounds = array<i64: 16, 1>}]} {
    %c0_i32 = arith.constant 0 : i32
    %0 = arith.cmpi eq, %arg1, %c0_i32 : i32
    %c0_i32_0 = arith.constant 0 : i32
    %1 = arith.cmpi eq, %arg2, %c0_i32_0 : i32
    %2 = arith.andi %0, %1 : i1
    %3 = arith.extui %2 : i1 to i32
    %c0_i32_1 = arith.constant 0 : i32
    %4 = arith.cmpi ne, %3, %c0_i32_1 : i32
    scf.if %4 {
      %cst_16 = arith.constant -1.000000e+30 : f32
      %22 = vector.broadcast %cst_16 : f32 to vector<16x1xf32>
      %c0_17 = arith.constant 0 : index
      %c0_18 = arith.constant 0 : index
      %23 = vector.load %arg10[%c0_17, %c0_18] : memref<16x1xf32, #tpu.memory_space<vmem>>, vector<16x1xf32>
      tpu.vector_store %arg10[%c0_17, %c0_18], %22 {strides = array<i32>} : memref<16x1xf32, #tpu.memory_space<vmem>>, vector<16x1xf32>,
      %cst_19 = arith.constant 0.000000e+00 : f32
      %24 = vector.broadcast %cst_19 : f32 to vector<16x1xf32>
      %c0_20 = arith.constant 0 : index
      %c0_21 = arith.constant 0 : index
      %25 = vector.load %arg11[%c0_20, %c0_21] : memref<16x1xf32, #tpu.memory_space<vmem>>, vector<16x1xf32>
      tpu.vector_store %arg11[%c0_20, %c0_21], %24 {strides = array<i32>} : memref<16x1xf32, #tpu.memory_space<vmem>>, vector<16x1xf32>,
      %cst_22 = arith.constant 0.000000e+00 : f32
      %26 = vector.broadcast %cst_22 : f32 to vector<16x1xf32>
      %c0_23 = arith.constant 0 : index
      %c0_24 = arith.constant 0 : index
      %27 = vector.load %arg12[%c0_23, %c0_24] : memref<16x1xf32, #tpu.memory_space<vmem>>, vector<16x1xf32>
      tpu.vector_store %arg12[%c0_23, %c0_24], %26 {strides = array<i32>} : memref<16x1xf32, #tpu.memory_space<vmem>>, vector<16x1xf32>,
    } else {
    }
    %c0_i32_2 = arith.constant 0 : i32
    %5 = arith.cmpi eq, %arg2, %c0_i32_2 : i32
    %6 = arith.extui %5 : i1 to i32
    %c0_i32_3 = arith.constant 0 : i32
    %7 = arith.cmpi ne, %6, %c0_i32_3 : i32
    scf.if %7 {
      %cst_16 = arith.constant 0.000000e+00 : f32
      %22 = vector.broadcast %cst_16 : f32 to vector<16x128xf32>
      %c0_17 = arith.constant 0 : index
      %c0_18 = arith.constant 0 : index
      %23 = vector.load %arg9[%c0_17, %c0_18] : memref<16x128xf32, #tpu.memory_space<vmem>>, vector<16x128xf32>
      tpu.vector_store %arg9[%c0_17, %c0_18], %22 {strides = array<i32>} : memref<16x128xf32, #tpu.memory_space<vmem>>, vector<16x128xf32>,
    } else {
    }
    %c0 = arith.constant 0 : index
    %c0_4 = arith.constant 0 : index
    %8 = vector.load %arg9[%c0, %c0_4] : memref<16x128xf32, #tpu.memory_space<vmem>>, vector<16x128xf32>
    %c0_5 = arith.constant 0 : index
    %c0_6 = arith.constant 0 : index
    %9 = vector.load %arg3[%c0_5, %c0_6] : memref<16x128xbf16, #tpu.memory_space<vmem>>, vector<16x128xbf16>
    %c0_7 = arith.constant 0 : index
    %c0_8 = arith.constant 0 : index
    %10 = vector.load %arg4[%c0_7, %c0_8] : memref<128x128xbf16, #tpu.memory_space<vmem>>, vector<128x128xbf16>
    %cst = arith.constant dense<0.000000e+00> : vector<16x128xf32>
    %11 = tpu.matmul %9, %10, %cst {dimension_numbers = #tpu.dot_dimension_numbers<[1], [0], [0], [1], [0, 0, 1, 1], [], []>} : vector<16x128xbf16>, vector<128x128xbf16>, vector<16x128xf32> -> vector<16x128xf32>
    %12 = arith.addf %8, %11 : vector<16x128xf32>
    %c0_9 = arith.constant 0 : index
    %c0_10 = arith.constant 0 : index
    %13 = vector.load %arg9[%c0_9, %c0_10] : memref<16x128xf32, #tpu.memory_space<vmem>>, vector<16x128xf32>
    tpu.vector_store %arg9[%c0_9, %c0_10], %12 {strides = array<i32>} : memref<16x128xf32, #tpu.memory_space<vmem>>, vector<16x128xf32>,
    %c0_i32_11 = arith.constant 0 : i32
    %14 = arith.cmpi eq, %arg2, %c0_i32_11 : i32
    %15 = arith.extui %14 : i1 to i32
    %c0_i32_12 = arith.constant 0 : i32
    %16 = arith.cmpi ne, %15, %c0_i32_12 : i32
    scf.if %16 {
      %c0_16 = arith.constant 0 : index
      %c0_17 = arith.constant 0 : index
      %22 = vector.load %arg9[%c0_16, %c0_17] : memref<16x128xf32, #tpu.memory_space<vmem>>, vector<16x128xf32>
      %c0_18 = arith.constant 0 : index
      %c0_19 = arith.constant 0 : index
      %23 = vector.load %arg5[%c0_18, %c0_19] : memref<1x128xf32, #tpu.memory_space<vmem>>, vector<1x128xf32>
      %24 = vector.broadcast %23 : vector<1x128xf32> to vector<16x128xf32>
      %25 = arith.addf %22, %24 : vector<16x128xf32>
      %c0_20 = arith.constant 0 : index
      %c0_21 = arith.constant 0 : index
      %26 = vector.load %arg7[%c0_20, %c0_21] : memref<16x128xf32, #tpu.memory_space<vmem>>, vector<16x128xf32>
      tpu.vector_store %arg7[%c0_20, %c0_21], %25 {strides = array<i32>} : memref<16x128xf32, #tpu.memory_space<vmem>>, vector<16x128xf32>,
      %27 = tpu.iota {dimensions = array<i32: 1>} : vector<16x128xi32>
      %c128_i32 = arith.constant 128 : i32
      %28 = arith.muli %arg1, %c128_i32 : i32
      %29 = vector.broadcast %28 : i32 to vector<16x128xi32>
      %30 = arith.addi %27, %29 : vector<16x128xi32>
      %c64_i32 = arith.constant 64 : i32
      %31 = vector.broadcast %c64_i32 : i32 to vector<16x128xi32>
      %32 = arith.cmpi slt, %30, %31 : vector<16x128xi32>
      %cst_22 = arith.constant -1.000000e+30 : f32
      %33 = vector.broadcast %cst_22 : f32 to vector<16x128xf32>
      %34 = arith.select %32, %25, %33 : vector<16x128xi1>, vector<16x128xf32>
      %c0_23 = arith.constant 0 : index
      %c0_24 = arith.constant 0 : index
      %35 = vector.load %arg10[%c0_23, %c0_24] : memref<16x1xf32, #tpu.memory_space<vmem>>, vector<16x1xf32>
      %cst_25 = arith.constant dense<0xFF800000> : vector<16xf32>
      %36 = vector.multi_reduction <maximumf>, %34, %cst_25 [1] : vector<16x128xf32> to vector<16xf32>
      %37 = vector.shape_cast %36 : vector<16xf32> to vector<16x1xf32>
      %38 = arith.maximumf %35, %37 : vector<16x1xf32>
      %c0_26 = arith.constant 0 : index
      %c0_27 = arith.constant 0 : index
      %39 = vector.load %arg11[%c0_26, %c0_27] : memref<16x1xf32, #tpu.memory_space<vmem>>, vector<16x1xf32>
      %40 = arith.subf %35, %38 : vector<16x1xf32>
      %41 = math.exp %40 : vector<16x1xf32>
      %42 = arith.mulf %39, %41 : vector<16x1xf32>
      %43 = vector.broadcast %38 : vector<16x1xf32> to vector<16x128xf32>
      %44 = arith.subf %34, %43 : vector<16x128xf32>
      %45 = math.exp %44 : vector<16x128xf32>
      %cst_28 = arith.constant dense<0.000000e+00> : vector<16xf32>
      %46 = vector.multi_reduction <add>, %45, %cst_28 [1] : vector<16x128xf32> to vector<16xf32>
      %47 = vector.shape_cast %46 : vector<16xf32> to vector<16x1xf32>
      %48 = arith.addf %42, %47 : vector<16x1xf32>
      %c0_29 = arith.constant 0 : index
      %c0_30 = arith.constant 0 : index
      %49 = vector.load %arg11[%c0_29, %c0_30] : memref<16x1xf32, #tpu.memory_space<vmem>>, vector<16x1xf32>
      tpu.vector_store %arg11[%c0_29, %c0_30], %48 {strides = array<i32>} : memref<16x1xf32, #tpu.memory_space<vmem>>, vector<16x1xf32>,
      %c0_31 = arith.constant 0 : index
      %c0_32 = arith.constant 0 : index
      %50 = vector.load %arg12[%c0_31, %c0_32] : memref<16x1xf32, #tpu.memory_space<vmem>>, vector<16x1xf32>
      %c0_33 = arith.constant 0 : index
      %c0_34 = arith.constant 0 : index
      %51 = vector.load %arg6[%c0_33, %c0_34] : memref<16x1xi32, #tpu.memory_space<vmem>>, vector<16x1xi32>
      %52 = vector.broadcast %51 : vector<16x1xi32> to vector<16x128xi32>
      %53 = arith.cmpi eq, %30, %52 : vector<16x128xi32>
      %cst_35 = arith.constant 0.000000e+00 : f32
      %54 = vector.broadcast %cst_35 : f32 to vector<16x128xf32>
      %55 = arith.select %53, %25, %54 : vector<16x128xi1>, vector<16x128xf32>
      %cst_36 = arith.constant dense<0.000000e+00> : vector<16xf32>
      %56 = vector.multi_reduction <add>, %55, %cst_36 [1] : vector<16x128xf32> to vector<16xf32>
      %57 = vector.shape_cast %56 : vector<16xf32> to vector<16x1xf32>
      %58 = arith.addf %50, %57 : vector<16x1xf32>
      %c0_37 = arith.constant 0 : index
      %c0_38 = arith.constant 0 : index
      %59 = vector.load %arg12[%c0_37, %c0_38] : memref<16x1xf32, #tpu.memory_space<vmem>>, vector<16x1xf32>
      tpu.vector_store %arg12[%c0_37, %c0_38], %58 {strides = array<i32>} : memref<16x1xf32, #tpu.memory_space<vmem>>, vector<16x1xf32>,
      %c0_39 = arith.constant 0 : index
      %c0_40 = arith.constant 0 : index
      %60 = vector.load %arg10[%c0_39, %c0_40] : memref<16x1xf32, #tpu.memory_space<vmem>>, vector<16x1xf32>
      tpu.vector_store %arg10[%c0_39, %c0_40], %38 {strides = array<i32>} : memref<16x1xf32, #tpu.memory_space<vmem>>, vector<16x1xf32>,
    } else {
    }
    %c0_i32_13 = arith.constant 0 : i32
    %17 = arith.cmpi eq, %arg1, %c0_i32_13 : i32
    %c0_i32_14 = arith.constant 0 : i32
    %18 = arith.cmpi eq, %arg2, %c0_i32_14 : i32
    %19 = arith.andi %17, %18 : i1
    %20 = arith.extui %19 : i1 to i32
    %c0_i32_15 = arith.constant 0 : i32
    %21 = arith.cmpi ne, %20, %c0_i32_15 : i32
    scf.if %21 {
      %22 = tpu.iota {dimensions = array<i32: 0>} : vector<16x1xi32>
      %c16_i32 = arith.constant 16 : i32
      %23 = arith.muli %arg0, %c16_i32 : i32
      %24 = vector.broadcast %23 : i32 to vector<16x1xi32>
      %25 = arith.addi %22, %24 : vector<16x1xi32>
      %c16_i32_16 = arith.constant 16 : i32
      %26 = vector.broadcast %c16_i32_16 : i32 to vector<16x1xi32>
      %27 = arith.cmpi slt, %25, %26 : vector<16x1xi32>
      %28 = arith.extui %27 : vector<16x1xi1> to vector<16x1xi32>
      %29 = arith.sitofp %28 : vector<16x1xi32> to vector<16x1xf32>
      %c0_17 = arith.constant 0 : index
      %c0_18 = arith.constant 0 : index
      %30 = vector.load %arg10[%c0_17, %c0_18] : memref<16x1xf32, #tpu.memory_space<vmem>>, vector<16x1xf32>
      %c0_19 = arith.constant 0 : index
      %c0_20 = arith.constant 0 : index
      %31 = vector.load %arg11[%c0_19, %c0_20] : memref<16x1xf32, #tpu.memory_space<vmem>>, vector<16x1xf32>
      %32 = math.log %31 : vector<16x1xf32>
      %33 = arith.addf %30, %32 : vector<16x1xf32>
      %c0_21 = arith.constant 0 : index
      %c0_22 = arith.constant 0 : index
      %34 = vector.load %arg12[%c0_21, %c0_22] : memref<16x1xf32, #tpu.memory_space<vmem>>, vector<16x1xf32>
      %35 = arith.subf %33, %34 : vector<16x1xf32>
      %36 = arith.mulf %35, %29 : vector<16x1xf32>
      %c0_23 = arith.constant 0 : index
      %c0_24 = arith.constant 0 : index
      %37 = vector.load %arg8[%c0_23, %c0_24] : memref<16x1xf32, #tpu.memory_space<vmem>>, vector<16x1xf32>
      tpu.vector_store %arg8[%c0_23, %c0_24], %36 {strides = array<i32>} : memref<16x1xf32, #tpu.memory_space<vmem>>, vector<16x1xf32>,
    } else {
    }
    return
  }
  func.func @transform_0(%arg0: i32, %arg1: i32, %arg2: i32) -> (i32, i32) {
    %c0_i32 = arith.constant 0 : i32
    return %arg0, %arg2 : i32, i32
  }
  func.func @transform_1(%arg0: i32, %arg1: i32, %arg2: i32) -> (i32, i32) {
    %c0_i32 = arith.constant 0 : i32
    return %arg2, %arg1 : i32, i32
  }
  func.func @transform_2(%arg0: i32, %arg1: i32, %arg2: i32) -> (i32, i32) {
    %c0_i32 = arith.constant 0 : i32
    %c0_i32_0 = arith.constant 0 : i32
    return %c0_i32, %arg1 : i32, i32
  }
  func.func @transform_3(%arg0: i32, %arg1: i32, %arg2: i32) -> (i32, i32) {
    %c0_i32 = arith.constant 0 : i32
    %c0_i32_0 = arith.constant 0 : i32
    return %arg0, %c0_i32 : i32, i32
  }
  func.func @transform_4(%arg0: i32, %arg1: i32, %arg2: i32) -> (i32, i32) {
    %c0_i32 = arith.constant 0 : i32
    return %arg0, %arg1 : i32, i32
  }
  func.func @transform_5(%arg0: i32, %arg1: i32, %arg2: i32) -> (i32, i32) {
    %c0_i32 = arith.constant 0 : i32
    %c0_i32_0 = arith.constant 0 : i32
    return %arg0, %c0_i32 : i32, i32
  }
}

</mosaic_0001>

<bundles_post_ra>
// kernel: hugginface_seqtune_forward.2
= control target key start
LH: loop header
LB: loop body
LE: loop exit
PB: predicated region body
PF: predicated region fallthrough
CT: control target
= control target key end

     0   :  { %v249_v0 = vmov 0.0   ;;  %vm250_vm0 = vmmov 0   ;;  %s304_s1 = inlined_call_operand.vmem [shape: bf16[128,128], index: 1, kind: input, shape index: {}]   ;;  %s305_s0 = inlined_call_operand.vmem [shape: bf16[16,128], index: 0, kind: input, shape index: {}]   ;;  %s306_s2 = inlined_call_operand.vmem [shape: f32[1,128], index: 2, kind: input, shape index: {}]   ;;  %s307_s3 = inlined_call_operand.vmem [shape: bf16[16,128], index: 3, kind: output, shape index: {}]  }
   0x1   :  { %214 = vmatprep.subr.bf16.mxu0 %v249_v0  ;;  %v236_v1 = vld [vmem:[%s304_s1] sm:$0xff]   ;;  %230 = vmatprep.mubr.msk.bf16.mxu0 %vm250_vm0, %v249_v0  ;;  %v237_v2 = vld [vmem:[%s304_s1 + $0x8] sm:$0xff]   ;;  %v238_v3 = vld [vmem:[%s304_s1 + $0x10] sm:$0xff]  }
   0x2   :  { %215 = vmatpush3.bf16.msra.mxu0 %v236_v1  ;;  %v239_v4 = vld [vmem:[%s304_s1 + $0x18] sm:$0xff]   ;;  %v240_v5 = vld [vmem:[%s304_s1 + $0x20] sm:$0xff]   ;;  %v241_v6 = vld [vmem:[%s304_s1 + $0x28] sm:$0xff]  }
   0x3   :  { %216 = vmatprep.subr.bf16.mxu0 %v249_v0  ;;  %v242_v7 = vld [vmem:[%s304_s1 + $0x30] sm:$0xff]   ;;  %v243_v8 = vld [vmem:[%s304_s1 + $0x38] sm:$0xff]   ;;  %v244_v9 = vld [vmem:[%s305_s0] sm:$0xff]  }
   0x4   :  { %v195_v10 = vld [vmem:[%s306_s2] ss:$0 sm:$0xff] }
   0x6   :  { %217 = vmatpush3.bf16.msra.mxu0 %v237_v2 }
   0x7   :  { %218 = vmatprep.subr.bf16.mxu0 %v249_v0 }
   0xa   :  { %219 = vmatpush3.bf16.msra.mxu0 %v238_v3 }
   0xb   :  { %220 = vmatprep.subr.bf16.mxu0 %v249_v0 }
   0xe   :  { %221 = vmatpush3.bf16.msra.mxu0 %v239_v4 }
   0xf   :  { %222 = vmatprep.subr.bf16.mxu0 %v249_v0 }
  0x12   :  { %223 = vmatpush3.bf16.msra.mxu0 %v240_v5 }
  0x13   :  { %224 = vmatprep.subr.bf16.mxu0 %v249_v0 }
  0x16   :  { %225 = vmatpush3.bf16.msra.mxu0 %v241_v6 }
  0x17   :  { %226 = vmatprep.subr.bf16.mxu0 %v249_v0 }
  0x1a   :  { %227 = vmatpush3.bf16.msra.mxu0 %v242_v7 }
  0x1b   :  { %228 = vmatprep.subr.bf16.mxu0 %v249_v0 }
  0x1e   :  { %229 = vmatpush3.bf16.msra.mxu0 %v243_v8 }
  0x21   :  { %231 = vmatmul.mubr.bf16.vlgmr.msra.gmra.mrb[0].mxu0 %v244_v9 }
  0xf4   :  { %v129_v11 = vpop.f32.mrb[0].mxu0 }
  0xf5   :  { %v152_v12 = vadd.f32 %v195_v10, %v129_v11  ;;  %v232_v13 = vpop.f32.mrb[1].mxu0 }
  0xf6   :  { %v132_v14 = vpop.f32.mrb[2].mxu0 }
  0xf7   :  { %v156_v15 = vmul.f32 0.044715, %v152_v12  ;;  %v153_v16 = vadd.f32 %v195_v10, %v132_v14  ;;  %v233_v17 = vpop.f32.mrb[3].mxu0  ;;  %v154_v30 = vmul.f32 0.5, %v152_v12 }
  0xf9   :  { %v158_v18 = vmul.f32 %v156_v15, %v152_v12  ;;  %v157_v19 = vmul.f32 0.044715, %v153_v16  ;;  %v155_v31 = vmul.f32 0.5, %v153_v16 }
  0xfb   :  { %v160_v20 = vmul.f32 %v158_v18, %v152_v12  ;;  %v159_v21 = vmul.f32 %v157_v19, %v153_v16 }
  0xfd   :  { %v162_v22 = vadd.f32 %v160_v20, %v152_v12  ;;  %v161_v23 = vmul.f32 %v159_v21, %v153_v16 }
  0xff   :  { %v164_v24 = vmul.f32 0.7978846, %v162_v22  ;;  %v163_v25 = vadd.f32 %v161_v23, %v153_v16 }
 0x101   :  { %245 = vtanh.f32 %v164_v24  ;;  %v165_v26 = vmul.f32 0.7978846, %v163_v25 }
 0x103   :  { %247 = vtanh.f32 %v165_v26 }
 0x10b   :  { %v246_v27 = vpop.eup %245 }
 0x10c   :  { %v168_v28 = vadd.f32 1.0, %v246_v27 }
 0x10d   :  { %v248_v29 = vpop.eup %247 }
 0x10e   :  { %v169_v32 = vadd.f32 1.0, %v248_v29  ;;  %v170_v33 = vmul.f32 %v168_v28, %v154_v30 }
 0x110   :  { %v171_v34 = vmul.f32 %v169_v32, %v155_v31 }
 0x112   :  { %v203_v35 = vpack.c.bf16 %v171_v34, %v170_v33 }
 0x114   :  { %204 = vst [vmem:[%s307_s3] sm:$0xff] %v203_v35  }

// kernel: hugginface_seqtune_forward.3
= control target key start
LH: loop header
LB: loop body
LE: loop exit
PB: predicated region body
PF: predicated region fallthrough
CT: control target
= control target key end

     0   :  { %v356_v0 = vmov 0.0   ;;  %vm357_vm0 = vmmov 0   ;;  %v358_v10 = vmov 0   ;;  %vm26_vm1 = vcmask 7168   ;;  %s452_s1 = inlined_call_operand.vmem [shape: bf16[128,128], index: 1, kind: input, shape index: {}]   ;;  %s453_s0 = inlined_call_operand.vmem [shape: bf16[16,128], index: 0, kind: input, shape index: {}]   ;;  %s454_s2 = inlined_call_operand.vmem [shape: f32[1,128], index: 2, kind: input, shape index: {}]   ;;  %s455_s4 = inlined_call_operand.vmem [shape: f32[16,128], index: 4, kind: output, shape index: {0}]   ;;  %s456_s3 = inlined_call_operand.vmem [shape: s32[16,1], index: 3, kind: input, shape index: {}]   ;;  %s457_s5 = inlined_call_operand.vmem [shape: f32[16,1], index: 5, kind: output, shape index: {1}]  }
   0x1   :  { %309 = vmatprep.subr.bf16.mxu0 %v356_v0  ;;  %v335_v1 = vld [vmem:[%s452_s1] sm:$0xff]   ;;  %325 = vmatprep.mubr.msk.bf16.mxu0 %vm357_vm0, %v356_v0  ;;  %v336_v2 = vld [vmem:[%s452_s1 + $0x8] sm:$0xff]   ;;  %v337_v3 = vld [vmem:[%s452_s1 + $0x10] sm:$0xff]   ;;  %v359_v11 = vmov -1e+30   ;;  %29 = vst.msk [vmem:[#allocation4] sm:$0xff] %vm26_vm1, %v356_v0  ;;  %v173_v12 = vlaneseq }
   0x2   :  { %310 = vmatpush3.bf16.msra.mxu0 %v335_v1  ;;  %v338_v4 = vld [vmem:[%s452_s1 + $0x18] sm:$0xff]   ;;  %v339_v5 = vld [vmem:[%s452_s1 + $0x20] sm:$0xff]   ;;  %v340_v6 = vld [vmem:[%s452_s1 + $0x28] sm:$0xff]   ;;  %334 = vset.pattern.permute.xlu0 %v358_v10  ;;  %27 = vst.msk [vmem:[#allocation3] sm:$0xff] %vm26_vm1, %v359_v11 }
   0x3   :  { %311 = vmatprep.subr.bf16.mxu0 %v356_v0  ;;  %v341_v7 = vld [vmem:[%s452_s1 + $0x30] sm:$0xff]   ;;  %v342_v8 = vld [vmem:[%s452_s1 + $0x38] sm:$0xff]   ;;  %v343_v9 = vld [vmem:[%s453_s0] sm:$0xff]   ;;  %333 = vset.pattern.permute.xlu1 %v358_v10  ;;  %28 = vst.msk [vmem:[#allocation3 + $0x8] sm:$0xff] %vm26_vm1, %v359_v11  ;;  %v174_v13 = vand.u32 127, %v173_v12 }
   0x4   :  { %30 = vst.msk [vmem:[#allocation4 + $0x8] sm:$0xff] %vm26_vm1, %v356_v0  ;;  %31 = vst.msk [vmem:[#allocation5] sm:$0xff] %vm26_vm1, %v356_v0  ;;  %v299_v14 = vld [vmem:[%s454_s2] ss:$0 sm:$0xff]  ;;  %v227_v32 = vld [vmem:[%s456_s3 + $0x8] sm:$0xff] }
   0x5   :  { %32 = vst.msk [vmem:[#allocation5 + $0x8] sm:$0xff] %vm26_vm1, %v356_v0  ;;  %vm178_vm2 = vcmp.lt.s32.totalorder %v174_v13, 64  ;;  %v226_v23 = vld [vmem:[%s456_s3] sm:$0xff] }
   0x6   :  { %312 = vmatpush3.bf16.msra.mxu0 %v336_v2 }
   0x7   :  { %313 = vmatprep.subr.bf16.mxu0 %v356_v0 }
   0x8   :  { %v189_v51 = vld [vmem:[#allocation4] sm:$0xff] }
   0x9   :  { %v181_v24 = vld [vmem:[#allocation3] sm:$0xff] }
   0xa   :  { %314 = vmatpush3.bf16.msra.mxu0 %v337_v3  ;;  %v182_v27 = vld [vmem:[#allocation3 + $0x8] sm:$0xff] }
   0xb   :  { %315 = vmatprep.subr.bf16.mxu0 %v356_v0  ;;  %v224_v45 = vld [vmem:[#allocation5] sm:$0xff]  ;;  %v190_v55 = vld [vmem:[#allocation4 + $0x8] sm:$0xff] }
   0xc   :  { %v225_v60 = vld [vmem:[#allocation5 + $0x8] sm:$0xff] }
   0xe   :  { %316 = vmatpush3.bf16.msra.mxu0 %v338_v4 }
   0xf   :  { %317 = vmatprep.subr.bf16.mxu0 %v356_v0 }
  0x12   :  { %318 = vmatpush3.bf16.msra.mxu0 %v339_v5 }
  0x13   :  { %319 = vmatprep.subr.bf16.mxu0 %v356_v0 }
  0x16   :  { %320 = vmatpush3.bf16.msra.mxu0 %v340_v6 }
  0x17   :  { %321 = vmatprep.subr.bf16.mxu0 %v356_v0 }
  0x1a   :  { %322 = vmatpush3.bf16.msra.mxu0 %v341_v7 }
  0x1b   :  { %323 = vmatprep.subr.bf16.mxu0 %v356_v0 }
  0x1e   :  { %324 = vmatpush3.bf16.msra.mxu0 %v342_v8 }
  0x21   :  { %326 = vmatmul.mubr.bf16.vlgmr.msra.gmra.mrb[0].mxu0 %v343_v9 }
  0xf4   :  { %v146_v15 = vpop.f32.mrb[0].mxu0 }
  0xf5   :  { %v169_v16 = vadd.f32 %v299_v14, %v146_v15  ;;  %v327_v17 = vpop.f32.mrb[1].mxu0 }
  0xf6   :  { %v149_v18 = vpop.f32.mrb[2].mxu0 }
  0xf7   :  { %171 = vst [vmem:[%s455_s4] sm:$0xff] %v169_v16  ;;  %v170_v19 = vadd.f32 %v299_v14, %v149_v18  ;;  %v328_v20 = vpop.f32.mrb[3].mxu0  ;;  %v179_v21 = vsel %vm178_vm2, %v169_v16, -1e+30 }
  0xf8   :  { %183 = vmax.xlane.f32.xlu0 %v179_v21 }
  0xf9   :  { %172 = vst [vmem:[%s455_s4 + $0x8] sm:$0xff] %v170_v19  ;;  %v180_v22 = vsel %vm178_vm2, %v170_v19, -1e+30 }
  0xfc   :  { %185 = vmax.xlane.f32.xlu0 %v180_v22 }
 0x112   :  { %229 = vperm.xlu0 %334, %v226_v23  }
 0x185   :  { %v184_v25 = vpop.xlane.xlu0 %183 }
 0x186   :  { %v187_v26 = vmax.f32 %v181_v24, %v184_v25 }
 0x188   :  { %v191_v28 = vsub.f32 %v181_v24, %v187_v26  ;;  %246 = vst.msk [vmem:[#allocation3] sm:$0xff] %vm26_vm1, %v187_v26  ;;  %201 = vperm.xlu1 %333, %v187_v26  }
 0x189   :  { %v186_v29 = vpop.xlane.xlu0 %185 }
 0x18a   :  { %v188_v30 = vmax.f32 %v182_v27, %v186_v29  ;;  %v193_v48 = vmul.f32 1.442695, %v191_v28 }
 0x18c   :  { %v192_v31 = vsub.f32 %v182_v27, %v188_v30  ;;  %247 = vst.msk [vmem:[#allocation3 + $0x8] sm:$0xff] %vm26_vm1, %v188_v30  ;;  %206 = vperm.xlu1 %333, %v188_v30  }
 0x18e   :  { %v195_v49 = vmul.f32 1.442695, %v192_v31 }
 0x18f   :  { %v263_v3 = vld [vmem:[#allocation3] sm:$0xff] }
 0x190   :  { %232 = vperm.xlu1 %333, %v227_v32  }
 0x191   :  { %v230_v33 = vpop.permute.xlu0 %229 }
 0x192   :  { %vm234_vm3 = vcmp.eq.s32.totalorder %v174_v13, %v230_v33 }
 0x193   :  { %v236_v34 = vsel %vm234_vm3, %v169_v16, 0.0  ;;  %v264_v9 = vld [vmem:[#allocation3 + $0x8] sm:$0xff] }
 0x194   :  { %238 = vadd.xlane.f32.xlu0 %v236_v34 }
 0x207   :  { %v202_v35 = vpop.permute.xlu1 %201 }
 0x208   :  { %v209_v36 = vsub.f32 %v179_v21, %v202_v35 }
 0x20a   :  { %v211_v37 = vmul.f32 1.442695, %v209_v36 }
 0x20b   :  { %v207_v38 = vpop.permute.xlu1 %206 }
 0x20c   :  { %344 = vpow2.f32 %v211_v37  ;;  %v210_v39 = vsub.f32 %v180_v22, %v207_v38 }
 0x20e   :  { %v213_v40 = vmul.f32 1.442695, %v210_v39 }
 0x20f   :  { %v233_v42 = vpop.permute.xlu1 %232 }
 0x210   :  { %346 = vpow2.f32 %v213_v40  ;;  %vm235_vm4 = vcmp.eq.s32.totalorder %v174_v13, %v233_v42 }
 0x211   :  { %v237_v44 = vsel %vm235_vm4, %v170_v19, 0.0  ;;  %348 = vpow2.f32 %v193_v48 }
 0x212   :  { %350 = vpow2.f32 %v195_v49 }
 0x216   :  { %v345_v41 = vpop.eup %344 }
 0x217   :  { %215 = vadd.xlane.f32.xlu1 %v345_v41 }
 0x21a   :  { %v347_v43 = vpop.eup %346 }
 0x21b   :  { %217 = vadd.xlane.f32.xlu1 %v347_v43  ;;  %v349_v50 = vpop.eup %348 }
 0x21c   :  { %v197_v52 = vmul.f32 %v349_v50, %v189_v51  ;;  %v351_v53 = vpop.eup %350 }
 0x21d   :  { %v198_v57 = vmul.f32 %v351_v53, %v190_v55 }
 0x21f   :  { %240 = vadd.xlane.f32.xlu1 %v237_v44 }
 0x221   :  { %v239_v46 = vpop.xlane.xlu0 %238 }
 0x222   :  { %v242_v47 = vadd.f32 %v239_v46, %v224_v45 }
 0x224   :  { %244 = vst.msk [vmem:[#allocation5] sm:$0xff] %vm26_vm1, %v242_v47 }
 0x22b   :  { %v273_v6 = vld [vmem:[#allocation5] sm:$0xff] }
 0x2a4   :  { %v216_v54 = vpop.xlane.xlu1 %215 }
 0x2a5   :  { %v219_v56 = vadd.f32 %v216_v54, %v197_v52 }
 0x2a7   :  { %222 = vst.msk [vmem:[#allocation4] sm:$0xff] %vm26_vm1, %v219_v56 }
 0x2a8   :  { %v218_v58 = vpop.xlane.xlu1 %217 }
 0x2a9   :  { %v220_v59 = vadd.f32 %v218_v58, %v198_v57 }
 0x2ab   :  { %223 = vst.msk [vmem:[#allocation4 + $0x8] sm:$0xff] %vm26_vm1, %v220_v59 }
 0x2ac   :  { %v241_v61 = vpop.xlane.xlu1 %240 }
 0x2ad   :  { %v243_v62 = vadd.f32 %v241_v61, %v225_v60 }
 0x2ae   :  { %v265_v63 = vld [vmem:[#allocation4] sm:$0xff] }
 0x2af   :  { %352 = vlog2.f32 %v265_v63  ;;  %245 = vst.msk [vmem:[#allocation5 + $0x8] sm:$0xff] %vm26_vm1, %v243_v62 }
 0x2b2   :  { %v266_v0 = vld [vmem:[#allocation4 + $0x8] sm:$0xff] }
 0x2b3   :  { %354 = vlog2.f32 %v266_v0 }
 0x2b6   :  { %v274_v11 = vld [vmem:[#allocation5 + $0x8] sm:$0xff] }
 0x2b9   :  { %v353_v1 = vpop.eup %352 }
 0x2ba   :  { %v268_v2 = vmul.f32 0.6931472, %v353_v1 }
 0x2bc   :  { %v271_v4 = vadd.f32 %v268_v2, %v263_v3 }
 0x2bd   :  { %v355_v5 = vpop.eup %354 }
 0x2be   :  { %v275_v7 = vsub.f32 %v271_v4, %v273_v6  ;;  %v270_v8 = vmul.f32 0.6931472, %v355_v5 }
 0x2c0   :  { %v272_v10 = vadd.f32 %v270_v8, %v264_v9  ;;  %280 = vst.msk [vmem:[%s457_s5] sm:$0xff] %vm26_vm1, %v275_v7 }
 0x2c2   :  { %v276_v12 = vsub.f32 %v272_v10, %v274_v11 }
 0x2c4   :  { %281 = vst.msk [vmem:[%s457_s5 + $0x8] sm:$0xff] %vm26_vm1, %v276_v12 }

</bundles_post_ra>
